<compile_context>
chip_gen: v7x
topology: tpu7x:2x2x1
jax: 0.10.0
libtpu: 0.0.40
codegen_flags: <defaults>
</compile_context>

<pallas_src>
import math

import jax
import jax.numpy as jnp
from jax.experimental import pallas as pl
from jax.experimental.pallas import tpu as pltpu

_LANE = 128   # lane width (last dim)
_SUB = 16     # bf16 sublane tile (second-to-last dim); also covers f32's 8


def _round_up(v, m):
    return (v + m - 1) // m * m


def _gcn_kernel(x_ref, w_ref, adj_ref, bias_ref, o_ref, supp_ref):
    # x_ref   : (Bt, Np, C)       input dtype (f32), batch tile
    # w_ref   : (C, Fp)           bf16, grid-invariant, single-buffered
    # adj_ref : (Np, Np)          bf16, grid-invariant, single-buffered
    # bias_ref: (1, Bt*Fp)        f32, bias pre-tiled Bt times, grid-invariant
    # o_ref   : (Bt, Np, Fp)      f32
    # supp_ref: (Np, Bt*Fp)       bf16 VMEM scratch (support, batch on lanes)
    bt, n, c = x_ref.shape
    fp = w_ref.shape[1]

    # ---- matmul #1: support = x @ W, batch fused along the sublane axis ----
    # In-kernel f32 -> bf16 cast (VPU work hidden under the MXU); f32 accum.
    x2d = x_ref[...].reshape(bt * n, c).astype(jnp.bfloat16)
    support = jnp.dot(x2d, w_ref[...], preferred_element_type=jnp.float32)
    support = support.astype(jnp.bfloat16)

    # ---- relayout (Bt*Np, Fp) -> (Np, Bt*Fp) via VMEM scratch --------------
    # Tile-aligned slices only (n % 16 == 0, fp % 128 == 0): pure load/store,
    # no XLU transpose. Bounds the live range of the bf16 support.
    for b in range(bt):
        supp_ref[:, b * fp:(b + 1) * fp] = support[b * n:(b + 1) * n, :]

    # ---- matmul #2: out = adj @ support for ALL batches in one wide dot ----
    out_wide = jnp.dot(adj_ref[...], supp_ref[...],
                       preferred_element_type=jnp.float32)   # (Np, Bt*Fp) f32
    out_wide = out_wide + bias_ref[...]                       # single bias add

    # ---- unpack back to (Bt, Np, Fp); Fp % 128 == 0 -> unmasked stores -----
    for b in range(bt):
        o_ref[b] = out_wide[:, b * fp:(b + 1) * fp].astype(o_ref.dtype)


def graph_convolution(x, weight, adj, bias):
    """x: (B, N, C), weight: (C, F), adj: (N, N), bias: (F,) -> (B, N, F)."""
    B, N, C = x.shape
    F = weight.shape[1]

    Fp = _round_up(F, _LANE)
    Np = _round_up(N, _SUB)

    # ---- adaptive VMEM budget: v7x has 64 MiB/TC, v5e/v6e have 128 MiB -----
    try:
        info = pltpu.get_tpu_info()
        vmem_phys = int(getattr(info, "vmem_capacity_bytes", 0)) or 64 * 1024 * 1024
    except Exception:
        vmem_phys = 64 * 1024 * 1024
    vmem_budget = max(32 * 1024 * 1024, int(vmem_phys * 0.75))

    x_itemsize = jnp.dtype(x.dtype).itemsize

    def vmem_estimate(bb):
        return (bb * Np * C * x_itemsize * 2     # x tile (double-buffered)
                + bb * Np * Fp * 4 * 2           # f32 out tile (double-buffered)
                + Np * bb * Fp * 2               # bf16 wide support scratch
                + Np * Np * 2                    # adj  (bf16, single-buffered)
                + C * Fp * 2                     # W    (bf16, single-buffered)
                + bb * Fp * 4)                   # tiled bias (f32, single-buf)

    # Batch tile: aim for ~1024 fused sublanes per grid step (amortize the
    # ~0.35us step overhead, fill the 256-wide MXU), capped by B / VMEM.
    block_b = max(1, min(B, max(1, 1024 // Np), 64))
    while block_b > 1 and vmem_estimate(block_b) > vmem_budget:
        block_b = max(1, block_b // 2)

    Bp = _round_up(B, block_b)
    steps = Bp // block_b
    # v7x has 2 TensorCores: prefer >=2 "parallel" grid steps when the halved
    # tile still keeps >=256 fused sublanes of MXU work.
    while steps < 2 and block_b > 1 and (block_b // 2) * Np >= 256:
        block_b //= 2
        Bp = _round_up(B, block_b)
        steps = Bp // block_b

    # ---- operand prep ------------------------------------------------------
    # x stays in its original dtype and keeps C unpadded: no extra HBM pass
    # over the big input (pad of B/N is a no-op when already aligned).
    if Bp == B and Np == N:
        x_p = x
    else:
        x_p = jnp.pad(x, ((0, Bp - B), (0, Np - N), (0, 0)))
    w_p = jnp.pad(weight.astype(jnp.bfloat16), ((0, 0), (0, Fp - F)))
    adj_p = jnp.pad(adj.astype(jnp.bfloat16), ((0, Np - N), (0, Np - N)))
    bias_wide = jnp.tile(
        jnp.pad(bias.astype(jnp.float32), (0, Fp - F)).reshape(1, Fp),
        (1, block_b))                                           # (1, block_b*Fp)

    grid = (steps,)

    out_p = pl.pallas_call(
        _gcn_kernel,
        out_shape=jax.ShapeDtypeStruct((Bp, Np, Fp), jnp.float32),
        grid_spec=pltpu.PrefetchScalarGridSpec(
            num_scalar_prefetch=0,
            grid=grid,
            in_specs=[
                pl.BlockSpec((block_b, Np, C), lambda i: (i, 0, 0)),      # x
                pl.BlockSpec((C, Fp), lambda i: (0, 0),
                             pipeline_mode=pl.Buffered(1)),               # W
                pl.BlockSpec((Np, Np), lambda i: (0, 0),
                             pipeline_mode=pl.Buffered(1)),               # adj
                pl.BlockSpec((1, block_b * Fp), lambda i: (0, 0),
                             pipeline_mode=pl.Buffered(1)),               # bias
            ],
            out_specs=pl.BlockSpec((block_b, Np, Fp), lambda i: (i, 0, 0)),
            scratch_shapes=[pltpu.VMEM((Np, block_b * Fp), jnp.bfloat16)],
        ),
        compiler_params=pltpu.CompilerParams(
            dimension_semantics=("parallel",),
            vmem_limit_bytes=int(min(vmem_budget, 112 * 1024 * 1024)),
        ),
    )(x_p, w_p, adj_p, bias_wide)

    return out_p[:B, :N, :F]


def reference_gcn(x, weight, adj, bias):
    support = jnp.einsum("bnc,cf->bnf", x, weight)
    out = jnp.einsum("nm,bmf->bnf", adj, support)
    return out + bias[None, None, :]


if __name__ == "__main__":
    # Small shapes consistent with the module's forward.
    B, N, C, F = 2, 16, 32, 32

    key = jax.random.PRNGKey(0)
    k_x, k_w, k_b, k_adj = jax.random.split(key, 4)

    # Deterministic parameter init mimicking reset_parameters():
    # uniform(-stdv, stdv) with stdv = 1/sqrt(out_features).
    stdv = 1.0 / math.sqrt(F)
    weight = jax.random.uniform(k_w, (C, F), jnp.float32, minval=-stdv, maxval=stdv)
    bias = jax.random.uniform(k_b, (F,), jnp.float32, minval=-stdv, maxval=stdv)

    # TODO(synk): the original module loads adj via np.load(mat_path); build a
    # deterministic row-normalized adjacency in-script instead.
    adj_raw = jax.random.uniform(k_adj, (N, N), jnp.float32)
    adj = adj_raw / jnp.sum(adj_raw, axis=1, keepdims=True)

    x = jax.random.normal(k_x, (B, N, C), jnp.float32)

    out = jax.jit(graph_convolution)(x, weight, adj, bias)
    out = jax.block_until_ready(out)

    ref = reference_gcn(x, weight, adj, bias)
    assert out.shape == (B, N, F)
    # bf16 matmul operands (f32 accumulation, support rounded to bf16 between
    # the two matmuls) -> ~1e-2-level error vs the f32 reference.
    assert jnp.allclose(out, ref, atol=3e-2, rtol=3e-2), "mismatch vs reference"

    print("KERNEL_OK")
</pallas_src>

<mosaic_0001>
module attributes {stable_mosaic.version = 11 : i64} {
  func.func @_gcn_kernel(%arg0: i32, %arg1: memref<2x16x32xf32, #tpu.memory_space<vmem>>, %arg2: memref<32x128xbf16, #tpu.memory_space<vmem>>, %arg3: memref<16x16xbf16, #tpu.memory_space<vmem>>, %arg4: memref<1x256xf32, #tpu.memory_space<vmem>>, %arg5: memref<2x16x128xf32, #tpu.memory_space<vmem>>, %arg6: memref<16x256xbf16, #tpu.memory_space<vmem>>) attributes {dimension_semantics = [#tpu.dimension_semantics<parallel>], iteration_bounds = array<i64: 1>, scalar_prefetch = 0 : i64, scratch_operands = 1 : i64, tpu.core_type = #tpu.core_type<tc>, window_params = [{transform_indices = @transform_0, window_bounds = array<i64: 2, 16, 32>}, {pipeline_mode = #tpu.pipeline_mode<synchronous>, transform_indices = @transform_1, window_bounds = array<i64: 32, 128>}, {pipeline_mode = #tpu.pipeline_mode<synchronous>, transform_indices = @transform_2, window_bounds = array<i64: 16, 16>}, {pipeline_mode = #tpu.pipeline_mode<synchronous>, transform_indices = @transform_3, window_bounds = array<i64: 1, 256>}, {transform_indices = @transform_4, window_bounds = array<i64: 2, 16, 128>}]} {
    %c0 = arith.constant 0 : index
    %c0_0 = arith.constant 0 : index
    %c0_1 = arith.constant 0 : index
    %0 = vector.load %arg1[%c0, %c0_0, %c0_1] : memref<2x16x32xf32, #tpu.memory_space<vmem>>, vector<2x16x32xf32>
    %1 = vector.shape_cast %0 : vector<2x16x32xf32> to vector<32x32xf32>
    %2 = arith.truncf %1 : vector<32x32xf32> to vector<32x32xbf16>
    %c0_2 = arith.constant 0 : index
    %c0_3 = arith.constant 0 : index
    %3 = vector.load %arg2[%c0_2, %c0_3] : memref<32x128xbf16, #tpu.memory_space<vmem>>, vector<32x128xbf16>
    %cst = arith.constant dense<0.000000e+00> : vector<32x128xf32>
    %4 = tpu.matmul %2, %3, %cst {dimension_numbers = #tpu.dot_dimension_numbers<[1], [0], [0], [1], [0, 0, 1, 1], [], []>} : vector<32x32xbf16>, vector<32x128xbf16>, vector<32x128xf32> -> vector<32x128xf32>
    %5 = arith.truncf %4 : vector<32x128xf32> to vector<32x128xbf16>
    %6 = vector.extract_strided_slice %5 {offsets = [0, 0], sizes = [16, 128], strides = [1, 1]} : vector<32x128xbf16> to vector<16x128xbf16>
    %c0_4 = arith.constant 0 : index
    %c0_5 = arith.constant 0 : index
    %7 = vector.load %arg6[%c0_4, %c0_5] : memref<16x256xbf16, #tpu.memory_space<vmem>>, vector<16x128xbf16>
    tpu.vector_store %arg6[%c0_4, %c0_5], %6 {strides = array<i32>} : memref<16x256xbf16, #tpu.memory_space<vmem>>, vector<16x128xbf16>,
    %8 = vector.extract_strided_slice %5 {offsets = [16, 0], sizes = [16, 128], strides = [1, 1]} : vector<32x128xbf16> to vector<16x128xbf16>
    %c0_6 = arith.constant 0 : index
    %c128 = arith.constant 128 : index
    %9 = vector.load %arg6[%c0_6, %c128] : memref<16x256xbf16, #tpu.memory_space<vmem>>, vector<16x128xbf16>
    tpu.vector_store %arg6[%c0_6, %c128], %8 {strides = array<i32>} : memref<16x256xbf16, #tpu.memory_space<vmem>>, vector<16x128xbf16>,
    %c0_7 = arith.constant 0 : index
    %c0_8 = arith.constant 0 : index
    %10 = vector.load %arg3[%c0_7, %c0_8] : memref<16x16xbf16, #tpu.memory_space<vmem>>, vector<16x16xbf16>
    %c0_9 = arith.constant 0 : index
    %c0_10 = arith.constant 0 : index
    %11 = vector.load %arg6[%c0_9, %c0_10] : memref<16x256xbf16, #tpu.memory_space<vmem>>, vector<16x256xbf16>
    %cst_11 = arith.constant dense<0.000000e+00> : vector<16x256xf32>
    %12 = tpu.matmul %10, %11, %cst_11 {dimension_numbers = #tpu.dot_dimension_numbers<[1], [0], [0], [1], [0, 0, 1, 1], [], []>} : vector<16x16xbf16>, vector<16x256xbf16>, vector<16x256xf32> -> vector<16x256xf32>
    %c0_12 = arith.constant 0 : index
    %c0_13 = arith.constant 0 : index
    %13 = vector.load %arg4[%c0_12, %c0_13] : memref<1x256xf32, #tpu.memory_space<vmem>>, vector<1x256xf32>
    %14 = vector.broadcast %13 : vector<1x256xf32> to vector<16x256xf32>
    %15 = arith.addf %12, %14 : vector<16x256xf32>
    %16 = vector.extract_strided_slice %15 {offsets = [0, 0], sizes = [16, 128], strides = [1, 1]} : vector<16x256xf32> to vector<16x128xf32>
    %c0_14 = arith.constant 0 : index
    %c0_15 = arith.constant 0 : index
    %c0_16 = arith.constant 0 : index
    %17 = vector.load %arg5[%c0_14, %c0_15, %c0_16] : memref<2x16x128xf32, #tpu.memory_space<vmem>>, vector<1x16x128xf32>
    %18 = vector.shape_cast %17 : vector<1x16x128xf32> to vector<16x128xf32>
    %19 = vector.shape_cast %16 : vector<16x128xf32> to vector<1x16x128xf32>
    tpu.vector_store %arg5[%c0_14, %c0_15, %c0_16], %19 {strides = array<i32>} : memref<2x16x128xf32, #tpu.memory_space<vmem>>, vector<1x16x128xf32>,
    %20 = vector.extract_strided_slice %15 {offsets = [0, 128], sizes = [16, 128], strides = [1, 1]} : vector<16x256xf32> to vector<16x128xf32>
    %c1 = arith.constant 1 : index
    %c0_17 = arith.constant 0 : index
    %c0_18 = arith.constant 0 : index
    %21 = vector.load %arg5[%c1, %c0_17, %c0_18] : memref<2x16x128xf32, #tpu.memory_space<vmem>>, vector<1x16x128xf32>
    %22 = vector.shape_cast %21 : vector<1x16x128xf32> to vector<16x128xf32>
    %23 = vector.shape_cast %20 : vector<16x128xf32> to vector<1x16x128xf32>
    tpu.vector_store %arg5[%c1, %c0_17, %c0_18], %23 {strides = array<i32>} : memref<2x16x128xf32, #tpu.memory_space<vmem>>, vector<1x16x128xf32>,
    return
  }
  func.func @transform_0(%arg0: i32) -> (i32, i32, i32) {
    %c0_i32 = arith.constant 0 : i32
    %c0_i32_0 = arith.constant 0 : i32
    %c0_i32_1 = arith.constant 0 : i32
    return %arg0, %c0_i32, %c0_i32_0 : i32, i32, i32
  }
  func.func @transform_1(%arg0: i32) -> (i32, i32) {
    %c0_i32 = arith.constant 0 : i32
    %c0_i32_0 = arith.constant 0 : i32
    %c0_i32_1 = arith.constant 0 : i32
    return %c0_i32, %c0_i32_0 : i32, i32
  }
  func.func @transform_2(%arg0: i32) -> (i32, i32) {
    %c0_i32 = arith.constant 0 : i32
    %c0_i32_0 = arith.constant 0 : i32
    %c0_i32_1 = arith.constant 0 : i32
    return %c0_i32, %c0_i32_0 : i32, i32
  }
  func.func @transform_3(%arg0: i32) -> (i32, i32) {
    %c0_i32 = arith.constant 0 : i32
    %c0_i32_0 = arith.constant 0 : i32
    %c0_i32_1 = arith.constant 0 : i32
    return %c0_i32, %c0_i32_0 : i32, i32
  }
  func.func @transform_4(%arg0: i32) -> (i32, i32, i32) {
    %c0_i32 = arith.constant 0 : i32
    %c0_i32_0 = arith.constant 0 : i32
    %c0_i32_1 = arith.constant 0 : i32
    return %arg0, %c0_i32, %c0_i32_0 : i32, i32, i32
  }
}

</mosaic_0001>

<bundles_post_ra>
// kernel: graph_convolution.1
= control target key start
LH: loop header
LB: loop body
LE: loop exit
PB: predicated region body
PF: predicated region fallthrough
CT: control target
= control target key end

     0   :  { %vm41_vm0 = vcmask 261120   ;;  %s304_s0 = inlined_call_operand.vmem [shape: f32[2,16,32], index: 0, kind: input, shape index: {}]   ;;  %s305_s1 = inlined_call_operand.vmem [shape: bf16[32,128], index: 1, kind: input, shape index: {}]   ;;  %s306_s2 = inlined_call_operand.vmem [shape: bf16[16,16], index: 2, kind: input, shape index: {}]   ;;  %s307_s3 = inlined_call_operand.vmem [shape: f32[1,256], index: 3, kind: input, shape index: {}]   ;;  %s308_s4 = inlined_call_operand.hbm [shape: f32[2,16,128], index: 4, kind: output, shape index: {}]  }
   0x1   :  { %v212_v0 = vld [vmem:[%s305_s1] sm:$0xff]   ;;  %v213_v1 = vld [vmem:[%s305_s1 + $0x8] sm:$0xff]   ;;  %v21_v4 = vld [vmem:[%s304_s0 + $0x10] sm:$0xff] }
   0x2   :  { %200 = vmatprep.subr.bf16.mxu0 %v212_v0  ;;  %v19_v2 = vld [vmem:[%s304_s0] sm:$0xff]  ;;  %v20_v3 = vld [vmem:[%s304_s0 + $0x8] sm:$0xff]  ;;  %v22_v6 = vld [vmem:[%s304_s0 + $0x18] sm:$0xff] }
   0x3   :  { %201 = vmatpush3.bf16.msra.mxu0 %v212_v0  ;;  %v23_v5 = vpack.c.bf16 %v20_v3, %v19_v2 }
   0x4   :  { %202 = vmatprep.subr.bf16.mxu0 %v213_v1 }
   0x5   :  { %9 = vsyncpa [#allocation4], 0  ;;  %204 = vmatprep.mubr.msk.bf16.mxu0 %vm41_vm0, %v23_v5  ;;  %v24_v7 = vpack.c.bf16 %v22_v6, %v21_v4  ;;  %v239_v8 = vmov 0   ;;  %v214_v15 = vld [vmem:[%s306_s2] sm:$0xff]   ;;  %vm122_vm1 = vcmask 130048   ;;  %v107_v16 = vlaneseq  ;;  %s240_s29 = smov [#allocation3]  }
   0x6   :  { %158 = vmatprep.mubr.bf16.mxu1 %v239_v8  ;;  %v105_v19 = vld [vmem:[%s307_s3] sm:$0x3]  ;;  %s179_s30 = sshll.u32 %s240_s29, 4  ;;  %s180_s30 = int_to_ptr.vmem [resolvable:$true] %s179_s30 }
   0x7   :  { %203 = vmatpush3.bf16.msra.mxu0 %v213_v1  ;;  %v108_v17 = vshrl.u32 %v107_v16, 7  ;;  %s215_s2 = scalar_lea.vmem %s180_s30, 512  ;;  %p220_p1 = scmp.lt.s32.totalorder %s180_s30, %s180_s30 }
   0x8   :  { %p216_p0 = scmp.ne.s32.totalorder %s180_s30, %s215_s2  ;;  %p221_p2 = scmp.lt.s32.totalorder %s215_s2, %s215_s2 }
   0x9   :  { %v109_v18 = vsub.s32 0, %v108_v17  ;;  %v113_v20 = vsub.s32 1, %v108_v17 }
   0xa   :  { %205 = vmatmul.mubr.msk.bf16.vlgmr.msra.gmra.mrb[0].mxu0 %vm41_vm0, %v24_v7  ;;  %p222_p3 = por %p221_p2, %p220_p1 }
   0xb   :  { %v110_v21 = vrot.slane %v105_v19, %v109_v18  ;;  %v114_v22 = vrot.slane %v105_v19, %v113_v20 }
   0xc   :  { %p223_p4 = pnand %p222_p3, %p216_p0 }
  0xdd   :  { %v206_v9 = vpop.f32.mrb[0].mxu0 }
  0xde   :  { %v82_v10 = vpop.f32.mrb[1].mxu0 }
  0xdf   :  { %v207_v11 = vpop.f32.mrb[2].mxu0 }
  0xe0   :  { %v85_v12 = vpop.f32.mrb[3].mxu0  ;;  %v98_v13 = vpack.c.bf16 %v207_v11, %v206_v9 }
  0xe1   :  { %v97_v14 = vpack.c.bf16 %v85_v12, %v82_v10 }
  0xe2   :  { %126 = vmatprep.subr.bf16.mxu1 %v98_v13 }
  0xe3   :  { %127 = vmatpush1.bf16.msra.mxu1 %v97_v14 }
  0xe6   :  { %195 = vmatmul.mubr.msk.bf16.vlgmr.msra.gmra.mrb[0].mxu1 %vm122_vm1, %v214_v15 }
 0x1b9   :  { %v160_v23 = vpop.f32.mrb[0].mxu1 }
 0x1ba   :  { %v161_v24 = vadd.f32 %v160_v23, %v110_v21  ;;  %v162_v25 = vpop.f32.mrb[1].mxu1 }
 0x1bb   :  { %v163_v26 = vadd.f32 %v162_v25, %v114_v22  ;;  %v164_v27 = vpop.f32.mrb[2].mxu1 }
 0x1bc   :  { %169 = vst [vmem:[#allocation3] sm:$0xff] %v161_v24  ;;  %v165_v28 = vadd.f32 %v164_v27, %v110_v21  ;;  %v166_v29 = vpop.f32.mrb[3].mxu1 }
 0x1bd   :  { %172 = vst [vmem:[#allocation3 + $0x10] sm:$0xff] %v163_v26  ;;  %v167_v30 = vadd.f32 %v166_v29, %v114_v22 }
 0x1be   :  { %170 = vst [vmem:[#allocation3 + $0x8] sm:$0xff] %v165_v28 }
 0x1bf   :  { %173 = vst [vmem:[#allocation3 + $0x18] sm:$0xff] %v167_v30 }
 0x1c0   :  { %226 = shalt.err (!%p223_p4)
}
 0x1c1   :  { %s227_s6 = scalar_lea.hbm %s308_s4, 512 }
 0x1c2   :  { %p228_p5 = scmp.ne.s32.totalorder %s308_s4, %s227_s6  ;;  %p231_p6 = scmp.lt.u32.totalorder %s227_s6, %s308_s4 }
 0x1c4   :  { %p233_p7 = pnand %p231_p6, %p228_p5 }
 0x1c6   :  { %236 = shalt.err (!%p233_p7)
}
 0x1c7   :  { %s241_s11 = smov 128   ;;  %s242_s12 = smov 8  }
 0x1c8   :  { %185 = dma.vmem_to_hbm [thread:$0]  %s180_s30, 512, %s308_s4, [#allocation4], %s241_s11, %s241_s11, %s242_s12  }
 0x1c9   :  { %237 = dma.done.wait [#allocation4], 512  }
 0x1ca   :  { %238 = vsyncadd [#allocation4], 4294966784 }
 0x1cb   :  { %189 = vsyncpa [#allocation4], 1 }

</bundles_post_ra>
